<compile_context>
chip_gen: v7x
topology: tpu7x:2x2x1
jax: 0.10.0
libtpu: 0.0.40
codegen_flags: <defaults>
</compile_context>

<pallas_src>
import functools
import math

import jax
import jax.numpy as jnp
from jax import lax
from jax.experimental import pallas as pl
from jax.experimental.pallas import tpu as pltpu

_EPS = 1e-6


# ----------------------------- helpers ------------------------------------- #
def _round_up(v, m):
    return ((v + m - 1) // m) * m


def _round_down(v, m):
    return (v // m) * m


@functools.lru_cache(maxsize=None)
def _vmem_budgets():
    """Generation-aware (scoped-VMEM limit, working-set budget) in bytes."""
    phys = None
    try:
        phys = getattr(pltpu.get_tpu_info(), "vmem_capacity_bytes", None)
    except Exception:
        phys = None
    if not phys:
        phys = 64 * 1024 * 1024                 # conservative default (v7x per-core VMEM)
    limit = int(min(phys * 3 // 4, 100 * 1024 * 1024))   # ~96 MiB v5e/v6e, ~48 MiB v7x
    budget = int(limit * 3 // 4)                          # headroom under the limit
    return limit, budget


def _pick_row_tile(rows, bytes_per_row, requested, budget):
    """Largest row tile whose working set stays within `budget`, aligned for full MXU
    passes (256, else 128, else the 8-row sublane packing). Full-array tile if it fits."""
    cap = max(8, budget // max(bytes_per_row, 1))
    tile = min(requested, cap, rows)
    if tile >= rows:
        return rows                              # block == full dim is always legal
    for align in (256, 128, 8):
        if tile >= align:
            return (tile // align) * align
    return 8


def _apply_act(y, act_type, n_true=None):
    """Activation map mirroring SincNet's act_fun (applied in f32). `n_true` masks
    lane padding inside log-softmax's reductions (other acts are elementwise)."""
    if act_type in (None, "linear"):             # 'linear' == LeakyReLU(1) == identity
        return y
    if act_type == "relu":
        return jnp.maximum(y, 0.0)
    if act_type == "tanh":
        return jnp.tanh(y)
    if act_type == "sigmoid":
        return 1.0 / (1.0 + jnp.exp(-y))
    if act_type in ("leaky_relu", "prelu"):
        # TODO(synk): PReLU's learnable slope is not threaded; uses the 0.2 init slope.
        return jnp.where(y >= 0, y, 0.2 * y)
    if act_type == "elu":
        return jnp.where(y > 0, y, jnp.expm1(y))
    if act_type == "selu":
        alpha, scale = 1.6732632423543772, 1.0507009873554805
        return scale * jnp.where(y > 0, y, alpha * jnp.expm1(y))
    if act_type == "softmax":                    # torch LogSoftmax(dim=1) on [B, F]
        n_pad = y.shape[-1]
        if n_true is None or n_true == n_pad:
            m = jnp.max(y, axis=-1, keepdims=True)
            z = y - m
            return z - jnp.log(jnp.sum(jnp.exp(z), axis=-1, keepdims=True))
        col = lax.broadcasted_iota(jnp.int32, y.shape, y.ndim - 1)
        mask = col < n_true
        m = jnp.max(jnp.where(mask, y, -jnp.inf), axis=-1, keepdims=True)
        z = y - m
        lse = jnp.log(jnp.sum(jnp.where(mask, jnp.exp(z), 0.0), axis=-1, keepdims=True))
        return jnp.where(mask, z - lse, 0.0)
    raise ValueError(f"unsupported activation: {act_type}")


def _sincnet_layernorm(y, gamma, beta, eps, approx_recip, n_true=None):
    """SincNet LayerNorm: unbiased std over the last dim, eps added to the std.
    When the lane dim is padded past `n_true`, reductions are masked to the true
    width (padded gamma/beta are zero, so padded output lanes are exactly 0)."""
    n_pad = y.shape[-1]
    if n_true is None or n_true == n_pad:
        n = n_pad
        mean = jnp.mean(y, axis=-1, keepdims=True)
        diff = y - mean
    else:
        n = n_true
        col = lax.broadcasted_iota(jnp.int32, y.shape, y.ndim - 1)
        mask = col < n_true
        mean = jnp.sum(jnp.where(mask, y, 0.0), axis=-1, keepdims=True) / n
        diff = jnp.where(mask, y - mean, 0.0)
    var = jnp.sum(diff * diff, axis=-1, keepdims=True) / (n - 1)   # torch .std() -> ddof=1
    inv = pl.reciprocal(jnp.sqrt(var) + eps, approx=approx_recip)  # EUP, off the VALU path
    return gamma * (diff * inv) + beta


# ----------------------- standalone LayerNorm kernel ------------------------ #
def _layernorm_kernel(x_ref, gamma_ref, beta_ref, o_ref, *, eps, approx_recip):
    x = x_ref[...].astype(jnp.float32)                 # (tile_rows, features)
    y = _sincnet_layernorm(x,
                           gamma_ref[...].astype(jnp.float32),
                           beta_ref[...].astype(jnp.float32),
                           eps, approx_recip)
    o_ref[...] = y.astype(o_ref.dtype)


def layer_norm(x, gamma, beta, eps=_EPS, *, tile_rows=1024, approx_recip=True):
    """SincNet LayerNorm over the last axis of x (any leading shape)."""
    orig_shape = x.shape
    features = orig_shape[-1]
    if features < 2:
        raise ValueError("SincNet LayerNorm needs features >= 2 (unbiased std divides by N-1).")
    x2 = x.reshape(-1, features)                       # free view, no HBM copy
    rows = x2.shape[0]

    vmem_limit, budget = _vmem_budgets()
    x_isz = jnp.dtype(x2.dtype).itemsize
    # in + out double-buffered, plus ~2 f32 temporaries (x_f32, diff) per row.
    per_row = features * (2 * x_isz + 2 * x_isz + 2 * 4)
    tr = _pick_row_tile(rows, per_row, tile_rows, budget)
    grid = pl.cdiv(rows, tr)                           # partial tail block: per-row op, store masked

    kernel = functools.partial(_layernorm_kernel, eps=eps, approx_recip=approx_recip)
    out = pl.pallas_call(
        kernel,
        out_shape=jax.ShapeDtypeStruct((rows, features), x.dtype),
        grid_spec=pltpu.PrefetchScalarGridSpec(
            num_scalar_prefetch=0,
            grid=(grid,),
            in_specs=[
                pl.BlockSpec((tr, features), lambda i: (i, 0)),
                pl.BlockSpec((1, features), lambda i: (0, 0)),   # gamma: resident
                pl.BlockSpec((1, features), lambda i: (0, 0)),   # beta:  resident
            ],
            out_specs=pl.BlockSpec((tr, features), lambda i: (i, 0)),
        ),
        compiler_params=pltpu.CompilerParams(
            dimension_semantics=("parallel",),
            vmem_limit_bytes=vmem_limit,
        ),
    )(x2, gamma.reshape(1, features), beta.reshape(1, features))
    return out.reshape(orig_shape)


# ---- fused [input-LN] -> Linear -> [SincNet-LN] -> activation kernel ------- #
def _fused_linear_kernel(*refs, n_true, eps, use_ln, act_type, approx_recip,
                         fuse_input_ln, k_tiled, mxu_dtype):
    if k_tiled:
        acc_ref = refs[-1]
        refs = refs[:-1]
    o_ref = refs[-1]
    x_ref, w_ref, b_ref, g_ref, be_ref = refs[:5]

    x = x_ref[...]
    if fuse_input_ln:                                   # only with a single K block
        g0_ref, b0_ref = refs[5], refs[6]
        x = _sincnet_layernorm(x.astype(jnp.float32),
                               g0_ref[...].astype(jnp.float32),
                               b0_ref[...].astype(jnp.float32),
                               eps, approx_recip)
    # bf16 MXU operands, f32 accumulation; the weight is already bf16 from the wrapper.
    part = jnp.dot(x.astype(mxu_dtype), w_ref[...].astype(mxu_dtype),
                   preferred_element_type=jnp.float32)

    def _epilogue(acc):
        y = acc + b_ref[...].astype(jnp.float32)        # (1, n_pad) bias broadcast
        if use_ln:
            y = _sincnet_layernorm(y,
                                   g_ref[...].astype(jnp.float32),
                                   be_ref[...].astype(jnp.float32),
                                   eps, approx_recip, n_true=n_true)
        y = _apply_act(y, act_type, n_true=n_true)
        o_ref[...] = y.astype(o_ref.dtype)

    if k_tiled:
        k = pl.program_id(1)

        @pl.when(k == 0)
        def _():
            acc_ref[...] = jnp.zeros_like(acc_ref)

        acc_ref[...] += part

        @pl.when(k == pl.num_programs(1) - 1)
        def _():
            _epilogue(acc_ref[...])
    else:
        _epilogue(part)


def linear_ln_act(x, w, b, gamma, beta, *, eps=_EPS, use_ln=True, act_type=None,
                  approx_recip=True, input_ln=None, tile_rows=1024, tile_k=None,
                  lane_pad=True, mxu_dtype=jnp.bfloat16):
    """y = act(LayerNorm(x @ w + b)) in a single pallas_call (LayerNorm optional;
    the model-input LayerNorm optionally fused as a prologue on the x tile).

    x may carry lane padding from a previous layer (columns beyond w.shape[0]); those
    hit zero-padded weight rows and contribute nothing.  The result is lane-padded to
    a multiple of 128 — callers slice the true width when they actually need it."""
    rows, k = x.shape
    k_w, n_true = w.shape
    if k_w > k:
        raise ValueError("weight has more input features than x provides")
    if use_ln and n_true < 2:
        raise ValueError("SincNet LayerNorm needs features >= 2 (unbiased std divides by N-1).")
    if input_ln is not None and k < 2:
        raise ValueError("input LayerNorm needs >= 2 features")

    out_dtype = x.dtype
    vmem_limit, budget = _vmem_budgets()
    w_isz = jnp.dtype(mxu_dtype).itemsize
    x_isz = jnp.dtype(x.dtype).itemsize
    o_isz = jnp.dtype(out_dtype).itemsize

    # Lane-dense output: pad N to a multiple of 128 with zero cols / bias / gamma / beta.
    n_pad = _round_up(n_true, 128) if lane_pad else n_true
    w = w.astype(mxu_dtype)
    if k_w < k or n_pad > n_true:
        w = jnp.pad(w, ((0, k - k_w), (0, n_pad - n_true)))
    if n_pad > n_true:
        b = jnp.pad(b, (0, n_pad - n_true))
        gamma = jnp.pad(gamma, (0, n_pad - n_true))
        beta = jnp.pad(beta, (0, n_pad - n_true))

    # K (contraction) tiling: only when the full bf16 weight won't fit comfortably.
    if tile_k is not None:
        tk = max(128, _round_down(int(tile_k), 128))
    elif 2 * k * n_pad * w_isz <= budget // 2:
        tk = k
    else:
        tk = _round_down(max(128, (budget // 2) // (2 * n_pad * w_isz)), 128)
        tk = max(tk, 128)
    k_tiled = tk < k
    if not k_tiled:
        tk = k

    # Input-LN fusion needs the full true K in one block; otherwise run it standalone.
    fuse_input_ln = input_ln is not None
    if k_tiled and fuse_input_ln:
        x = layer_norm(x, input_ln[0], input_ln[1], eps=eps, approx_recip=approx_recip)
        fuse_input_ln = False

    if k_tiled:
        k_padded = _round_up(k, tk)
        if k_padded > k:                             # zero pad: no contribution to the dot
            x = jnp.pad(x, ((0, 0), (0, k_padded - k)))
            w = jnp.pad(w, ((0, k_padded - k), (0, 0)))
        nk = k_padded // tk
    else:
        nk = 1

    # Row tiling: account in/out double buffers + f32 accumulator/epilogue temporaries.
    per_row = (2 * tk * x_isz                        # x tile, double-buffered
               + 2 * n_pad * o_isz                   # output tile, double-buffered
               + (4 * n_pad if k_tiled else 0)       # f32 accumulator scratch
               + 3 * 4 * n_pad)                      # f32 epilogue temporaries (y/diff/...)
    row_budget = max(budget - 2 * tk * n_pad * w_isz - 8 * n_pad * 4, 2 * 1024 * 1024)
    tm = _pick_row_tile(rows, per_row, tile_rows, row_budget)
    nr = pl.cdiv(rows, tm)

    b2 = b.reshape(1, n_pad).astype(jnp.float32)
    g2 = gamma.reshape(1, n_pad).astype(jnp.float32)
    be2 = beta.reshape(1, n_pad).astype(jnp.float32)

    if k_tiled:
        grid = (nr, nk)                              # K last, sequential ("arbitrary")
        x_spec = pl.BlockSpec((tm, tk), lambda i, kk: (i, kk))
        w_spec = pl.BlockSpec((tk, n_pad), lambda i, kk: (kk, 0))
        vec_spec = pl.BlockSpec((1, n_pad), lambda i, kk: (0, 0))
        out_spec = pl.BlockSpec((tm, n_pad), lambda i, kk: (i, 0))
        scratch = [pltpu.VMEM((tm, n_pad), jnp.float32)]
        dims = ("parallel", "arbitrary")
    else:
        grid = (nr,)
        x_spec = pl.BlockSpec((tm, tk), lambda i: (i, 0))
        w_spec = pl.BlockSpec((tk, n_pad), lambda i: (0, 0))    # weight: resident
        vec_spec = pl.BlockSpec((1, n_pad), lambda i: (0, 0))
        out_spec = pl.BlockSpec((tm, n_pad), lambda i: (i, 0))
        scratch = []
        dims = ("parallel",)
    # NOTE: bias/gamma/beta are tiny (1 x n_pad); pl.Buffered(1) would only save a few
    # KiB of VMEM now that the big weight is K-tiled, so default buffering is kept.

    in_specs = [x_spec, w_spec, vec_spec, vec_spec, vec_spec]
    operands = [x, w, b2, g2, be2]
    if fuse_input_ln:
        ln0_spec = pl.BlockSpec((1, tk), lambda i: (0, 0))
        in_specs += [ln0_spec, ln0_spec]
        operands += [input_ln[0].reshape(1, k).astype(jnp.float32),
                     input_ln[1].reshape(1, k).astype(jnp.float32)]

    kernel = functools.partial(
        _fused_linear_kernel, n_true=n_true, eps=eps, use_ln=use_ln,
        act_type=act_type, approx_recip=approx_recip,
        fuse_input_ln=fuse_input_ln, k_tiled=k_tiled, mxu_dtype=mxu_dtype)

    return pl.pallas_call(
        kernel,
        out_shape=jax.ShapeDtypeStruct((rows, n_pad), out_dtype),
        grid_spec=pltpu.PrefetchScalarGridSpec(
            num_scalar_prefetch=0,
            grid=grid,
            in_specs=in_specs,
            out_specs=out_spec,
            scratch_shapes=scratch,
        ),
        compiler_params=pltpu.CompilerParams(
            dimension_semantics=dims,
            vmem_limit_bytes=vmem_limit,
        ),
    )(*operands)


# ------------------------------- MLP wrapper -------------------------------- #
def init_mlp_params(key, options):
    """Deterministic init matching the torch module's __init__ (same scales)."""
    params = {"w": [], "b": [], "ln_gamma": [], "ln_beta": []}
    input_dim = int(options["input_dim"])
    if options["fc_use_laynorm_inp"]:
        params["ln0_gamma"] = jnp.ones((input_dim,), jnp.float32)
        params["ln0_beta"] = jnp.zeros((input_dim,), jnp.float32)
    cur = input_dim
    for nout in options["fc_lay"]:
        key, sub = jax.random.split(key)
        lim = math.sqrt(0.01 / (cur + nout))
        params["w"].append(jax.random.uniform(sub, (cur, nout), jnp.float32,
                                              minval=-lim, maxval=lim))
        params["b"].append(jnp.zeros((nout,), jnp.float32))  # module always ends up with a bias param
        params["ln_gamma"].append(jnp.ones((nout,), jnp.float32))
        params["ln_beta"].append(jnp.zeros((nout,), jnp.float32))
        cur = nout
    return params


def mlp_forward(params, options, x, *, approx_recip=True, mxu_dtype=jnp.bfloat16):
    """Pallas forward pass mirroring MLP.forward (inference: dropout = identity)."""
    if options.get("fc_use_batchnorm_inp"):
        # TODO(synk): BatchNorm1d input normalization (batch/running stats) not implemented.
        raise NotImplementedError("fc_use_batchnorm_inp is not supported")
    input_ln = None
    if options["fc_use_laynorm_inp"]:
        input_ln = (params["ln0_gamma"], params["ln0_beta"])

    n_lay = len(options["fc_lay"])
    if n_lay == 0:
        if input_ln is not None:
            x = layer_norm(x, *input_ln, eps=_EPS, approx_recip=approx_recip)
        return x

    # TODO(synk): when every layer's weights fit VMEM at once, a single whole-MLP
    # pallas_call (all weights resident) would also remove the remaining per-layer
    # HBM round-trips of the activations.
    for i, _ in enumerate(options["fc_lay"]):
        if options["fc_use_batchnorm"][i]:
            # TODO(synk): per-layer BatchNorm1d path not implemented in Pallas.
            raise NotImplementedError("fc_use_batchnorm is not supported")
        act = options["fc_act"][i]
        x = linear_ln_act(
            x, params["w"][i], params["b"][i],
            params["ln_gamma"][i], params["ln_beta"][i],
            eps=_EPS,
            use_ln=options["fc_use_laynorm"][i],
            act_type=(None if act == "linear" else act),
            approx_recip=approx_recip,
            input_ln=(input_ln if i == 0 else None),   # fused input LayerNorm
            mxu_dtype=mxu_dtype,
        )
        # Dropout: identity at inference time.
    n_final = options["fc_lay"][-1]
    if x.shape[-1] != n_final:
        x = x[:, :n_final]                             # drop lane padding of last layer
    return x


# ------------------------------- references --------------------------------- #
def _ln_ref(x, gamma, beta, eps=_EPS):
    mean = jnp.mean(x, axis=-1, keepdims=True)
    std = jnp.std(x, axis=-1, keepdims=True, ddof=1)
    return gamma * (x - mean) / (std + eps) + beta


def mlp_forward_ref(params, options, x):
    if options["fc_use_laynorm_inp"]:
        x = _ln_ref(x, params["ln0_gamma"], params["ln0_beta"])
    for i, _ in enumerate(options["fc_lay"]):
        y = jnp.dot(x, params["w"][i],
                    precision=jax.lax.Precision.HIGHEST) + params["b"][i]
        if options["fc_use_laynorm"][i]:
            y = _ln_ref(y, params["ln_gamma"][i], params["ln_beta"][i])
        act = options["fc_act"][i]
        if act != "linear":
            y = _apply_act(y, act)
        x = y
    return x


# ---------------------------------- demo ------------------------------------ #
if __name__ == "__main__":
    options = {
        "input_dim": 64,
        "fc_lay": [32, 32],
        "fc_drop": [0.0, 0.0],
        "fc_use_batchnorm": [False, False],
        "fc_use_laynorm": [True, True],
        "fc_use_laynorm_inp": True,
        "fc_use_batchnorm_inp": False,
        "fc_act": ["leaky_relu", "linear"],
    }
    batch = 4

    key = jax.random.PRNGKey(0)
    k_x, k_p, k_a, k_b, k_c = jax.random.split(key, 5)
    x = jax.random.normal(k_x, (batch, options["input_dim"]), dtype=jnp.float32)
    params = init_mlp_params(k_p, options)

    # 1) Standalone LayerNorm kernel, exact reciprocal -> tight tolerance.
    ln_out = jax.block_until_ready(
        layer_norm(x, params["ln0_gamma"], params["ln0_beta"], eps=_EPS, approx_recip=False))
    ln_ref_out = _ln_ref(x, params["ln0_gamma"], params["ln0_beta"])
    assert jnp.allclose(ln_out, ln_ref_out, atol=1e-5, rtol=1e-5)

    # 2) Full MLP forward: fused input-LN, bf16 MXU, lane-padded intermediate outputs.
    out = jax.block_until_ready(mlp_forward(params, options, x))
    ref = mlp_forward_ref(params, options, x)
    assert out.shape == (batch, options["fc_lay"][-1])
    err = float(jnp.max(jnp.abs(out - ref)))
    assert jnp.allclose(out, ref, atol=5e-2, rtol=5e-2), err

    # 3) K-tiled accumulator path + K/lane zero-padding, checked on its own.
    rows2, k2, n2 = 64, 200, 96
    x2 = jax.random.normal(k_a, (rows2, k2), jnp.float32)
    w2 = jax.random.uniform(k_b, (k2, n2), jnp.float32, minval=-0.05, maxval=0.05)
    b2 = 0.1 * jax.random.normal(k_c, (n2,), jnp.float32)
    g2 = jnp.ones((n2,), jnp.float32)
    be2 = jnp.zeros((n2,), jnp.float32)
    out2 = jax.block_until_ready(
        linear_ln_act(x2, w2, b2, g2, be2, eps=_EPS, use_ln=True,
                      act_type="leaky_relu", approx_recip=True, tile_k=128))
    assert out2.shape == (rows2, 128)                    # lane-padded to 128
    ref2 = _apply_act(
        _ln_ref(jnp.dot(x2, w2, precision=jax.lax.Precision.HIGHEST) + b2, g2, be2),
        "leaky_relu")
    err2 = float(jnp.max(jnp.abs(out2[:, :n2] - ref2)))
    assert jnp.allclose(out2[:, :n2], ref2, atol=5e-2, rtol=5e-2), err2

    print("KERNEL_OK")
</pallas_src>

<mosaic_0001>
module attributes {stable_mosaic.version = 11 : i64} {
  func.func @_layernorm_kernel(%arg0: i32, %arg1: memref<4x64xf32, #tpu.memory_space<vmem>>, %arg2: memref<1x64xf32, #tpu.memory_space<vmem>>, %arg3: memref<1x64xf32, #tpu.memory_space<vmem>>, %arg4: memref<4x64xf32, #tpu.memory_space<vmem>>) attributes {dimension_semantics = [#tpu.dimension_semantics<parallel>], iteration_bounds = array<i64: 1>, scalar_prefetch = 0 : i64, scratch_operands = 0 : i64, tpu.core_type = #tpu.core_type<tc>, window_params = [{transform_indices = @transform_0, window_bounds = array<i64: 4, 64>}, {pipeline_mode = #tpu.pipeline_mode<synchronous>, transform_indices = @transform_1, window_bounds = array<i64: 1, 64>}, {pipeline_mode = #tpu.pipeline_mode<synchronous>, transform_indices = @transform_2, window_bounds = array<i64: 1, 64>}, {transform_indices = @transform_3, window_bounds = array<i64: 4, 64>}]} {
    %c0 = arith.constant 0 : index
    %c0_0 = arith.constant 0 : index
    %0 = vector.load %arg1[%c0, %c0_0] : memref<4x64xf32, #tpu.memory_space<vmem>>, vector<4x64xf32>
    %c0_1 = arith.constant 0 : index
    %c0_2 = arith.constant 0 : index
    %1 = vector.load %arg2[%c0_1, %c0_2] : memref<1x64xf32, #tpu.memory_space<vmem>>, vector<1x64xf32>
    %c0_3 = arith.constant 0 : index
    %c0_4 = arith.constant 0 : index
    %2 = vector.load %arg3[%c0_3, %c0_4] : memref<1x64xf32, #tpu.memory_space<vmem>>, vector<1x64xf32>
    %cst = arith.constant dense<0.000000e+00> : vector<4xf32>
    %3 = vector.multi_reduction <add>, %0, %cst [1] : vector<4x64xf32> to vector<4xf32>
    %4 = vector.shape_cast %3 : vector<4xf32> to vector<4x1xf32>
    %cst_5 = arith.constant 6.400000e+01 : f32
    %5 = vector.broadcast %cst_5 : f32 to vector<4x1xf32>
    %6 = arith.divf %4, %5 : vector<4x1xf32>
    %7 = vector.broadcast %6 : vector<4x1xf32> to vector<4x64xf32>
    %8 = arith.subf %0, %7 : vector<4x64xf32>
    %9 = arith.mulf %8, %8 : vector<4x64xf32>
    %cst_6 = arith.constant dense<0.000000e+00> : vector<4xf32>
    %10 = vector.multi_reduction <add>, %9, %cst_6 [1] : vector<4x64xf32> to vector<4xf32>
    %11 = vector.shape_cast %10 : vector<4xf32> to vector<4x1xf32>
    %cst_7 = arith.constant 6.300000e+01 : f32
    %12 = vector.broadcast %cst_7 : f32 to vector<4x1xf32>
    %13 = arith.divf %11, %12 : vector<4x1xf32>
    %14 = math.sqrt %13 : vector<4x1xf32>
    %cst_8 = arith.constant 9.99999997E-7 : f32
    %15 = vector.broadcast %cst_8 : f32 to vector<4x1xf32>
    %16 = arith.addf %14, %15 : vector<4x1xf32>
    %17 = tpu.reciprocal %16 : vector<4x1xf32> -> vector<4x1xf32>
    %18 = vector.broadcast %17 : vector<4x1xf32> to vector<4x64xf32>
    %19 = arith.mulf %8, %18 : vector<4x64xf32>
    %20 = vector.broadcast %1 : vector<1x64xf32> to vector<4x64xf32>
    %21 = arith.mulf %20, %19 : vector<4x64xf32>
    %22 = vector.broadcast %2 : vector<1x64xf32> to vector<4x64xf32>
    %23 = arith.addf %21, %22 : vector<4x64xf32>
    %c0_9 = arith.constant 0 : index
    %c0_10 = arith.constant 0 : index
    %24 = vector.load %arg4[%c0_9, %c0_10] : memref<4x64xf32, #tpu.memory_space<vmem>>, vector<4x64xf32>
    tpu.vector_store %arg4[%c0_9, %c0_10], %23 {strides = array<i32>} : memref<4x64xf32, #tpu.memory_space<vmem>>, vector<4x64xf32>,
    return
  }
  func.func @transform_0(%arg0: i32) -> (i32, i32) {
    %c0_i32 = arith.constant 0 : i32
    %c0_i32_0 = arith.constant 0 : i32
    return %arg0, %c0_i32 : i32, i32
  }
  func.func @transform_1(%arg0: i32) -> (i32, i32) {
    %c0_i32 = arith.constant 0 : i32
    %c0_i32_0 = arith.constant 0 : i32
    %c0_i32_1 = arith.constant 0 : i32
    return %c0_i32, %c0_i32_0 : i32, i32
  }
  func.func @transform_2(%arg0: i32) -> (i32, i32) {
    %c0_i32 = arith.constant 0 : i32
    %c0_i32_0 = arith.constant 0 : i32
    %c0_i32_1 = arith.constant 0 : i32
    return %c0_i32, %c0_i32_0 : i32, i32
  }
  func.func @transform_3(%arg0: i32) -> (i32, i32) {
    %c0_i32 = arith.constant 0 : i32
    %c0_i32_0 = arith.constant 0 : i32
    return %arg0, %c0_i32 : i32, i32
  }
}

</mosaic_0001>

<bundles_post_ra>
// kernel: tpu_custom_call.1
= control target key start
LH: loop header
LB: loop body
LE: loop exit
PB: predicated region body
PF: predicated region fallthrough
CT: control target
= control target key end

     0   :  { %8 = vsyncpa [#allocation3], 0  ;;  %s194_s0 = inlined_call_operand.hbm [shape: f32[4,64], index: 0, kind: input, shape index: {}]   ;;  %s195_s1 = inlined_call_operand.vmem [shape: f32[1,64], index: 1, kind: input, shape index: {}]   ;;  %s196_s2 = inlined_call_operand.vmem [shape: f32[1,64], index: 2, kind: input, shape index: {}]   ;;  %s197_s3 = inlined_call_operand.hbm [shape: f32[4,64], index: 3, kind: output, shape index: {}]  }
   0x1   :  { %9 = vsyncpa [#allocation4], 0  ;;  %s139_s12 = smov [#allocation2]   ;;  %s91_s16 = scalar_lea.hbm %s194_s0, 64 }
   0x2   :  { %s16_s13 = sshll.u32 %s139_s12, 4  ;;  %p92_p0 = scmp.ne.s32.totalorder %s194_s0, %s91_s16  ;;  %s17_s13 = int_to_ptr.vmem [resolvable:$true] %s16_s13 }
   0x3   :  { %p95_p1 = scmp.lt.u32.totalorder %s91_s16, %s194_s0 }
   0x5   :  { %p97_p2 = pnand %p95_p1, %p92_p0 }
   0x7   :  { %100 = shalt.err (!%p97_p2)
}
   0x8   :  { %s101_s21 = scalar_lea.vmem %s17_s13, 64  ;;  %p106_p4 = scmp.lt.s32.totalorder %s17_s13, %s17_s13 }
   0x9   :  { %p102_p3 = scmp.ne.s32.totalorder %s17_s13, %s101_s21  ;;  %p107_p5 = scmp.lt.s32.totalorder %s101_s21, %s101_s21 }
   0xb   :  { %p108_p6 = por %p107_p5, %p106_p4 }
   0xd   :  { %p109_p7 = pnand %p108_p6, %p102_p3 }
   0xf   :  { %112 = shalt.err (!%p109_p7)
}
  0x10   :  { %19 = dma.hbm_to_vmem [thread:$0]  %s194_s0, 64, %s17_s13, [#allocation3]  }
  0x11   :  { %135 = dma.done.wait [#allocation3], 64  }
  0x12   :  { %136 = vsyncadd [#allocation3], 4294967232  ;;  %vm30_vm0 = vcmask 519168   ;;  %v27_v0 = vld [vmem:[#allocation2] sm:$0xf]  ;;  %s140_s27 = smov [#allocation5]  }
  0x13   :  { %v31_v1 = vsel %vm30_vm0, %v27_v0, 0.0  ;;  %v83_v16 = vld [vmem:[%s195_s1] ss:$0 sm:$0xff]  ;;  %s74_s28 = sshll.u32 %s140_s27, 4  ;;  %s75_s28 = int_to_ptr.vmem [resolvable:$true] %s74_s28 }
  0x14   :  { %32 = vadd.xlane.f32.xlu0 %v31_v1  ;;  %v84_v18 = vld [vmem:[%s196_s2] ss:$0 sm:$0xff]  ;;  %s113_s29 = scalar_lea.vmem %s75_s28, 64  ;;  %p118_p9 = scmp.lt.s32.totalorder %s75_s28, %s75_s28 }
  0x15   :  { %p114_p8 = scmp.ne.s32.totalorder %s75_s28, %s113_s29  ;;  %p119_p10 = scmp.lt.s32.totalorder %s113_s29, %s113_s29 }
  0x17   :  { %p120_p11 = por %p119_p10, %p118_p9 }
  0x19   :  { %p121_p12 = pnand %p120_p11, %p114_p8 }
  0xa1   :  { %v33_v2 = vpop.xlane.xlu0 %32 }
  0xa2   :  { %v35_v3 = vmul.f32 0.015625, %v33_v2 }
  0xa4   :  { %v36_v4 = vsub.f32 %v27_v0, %v35_v3 }
  0xa6   :  { %v37_v5 = vmul.f32 %v36_v4, %v36_v4 }
  0xa8   :  { %v38_v6 = vsel %vm30_vm0, %v37_v5, 0.0 }
  0xa9   :  { %39 = vadd.xlane.f32.xlu0 %v38_v6 }
 0x136   :  { %v40_v7 = vpop.xlane.xlu0 %39 }
 0x137   :  { %v42_v8 = vmul.f32 0.015873017, %v40_v7 }
 0x139   :  { %87 = vrsqrt.f32 %v42_v8  ;;  %vm45_vm1 = vcmp.eq.f32.partialorder %v42_v8, inf  ;;  %v48_v11 = vand.u32 2147483648, %v42_v8  ;;  %vm47_vm2 = vcmp.eq.f32.partialorder %v42_v8, 0.0 }
 0x143   :  { %v88_v9 = vpop.eup %87 }
 0x144   :  { %v44_v10 = vmul.f32 %v88_v9, %v42_v8 }
 0x146   :  { %v46_v12 = vsel %vm45_vm1, %v42_v8, %v44_v10 }
 0x147   :  { %v49_v13 = vsel %vm47_vm2, %v48_v11, %v46_v12 }
 0x148   :  { %v50_v14 = vadd.f32 1e-06, %v49_v13 }
 0x14a   :  { %89 = vrcp.f32 %v50_v14 }
 0x154   :  { %v90_v15 = vpop.eup %89 }
 0x155   :  { %v52_v17 = vmul.f32 %v90_v15, %v36_v4 }
 0x157   :  { %v59_v19 = vmul.f32 %v83_v16, %v52_v17 }
 0x159   :  { %v66_v20 = vadd.f32 %v84_v18, %v59_v19 }
 0x15b   :  { %67 = vst.msk [vmem:[#allocation5] sm:$0xf] %vm30_vm0, %v66_v20 }
 0x15c   :  { %124 = shalt.err (!%p121_p12)
}
 0x15d   :  { %s125_s4 = scalar_lea.hbm %s197_s3, 64 }
 0x15e   :  { %p126_p13 = scmp.ne.s32.totalorder %s197_s3, %s125_s4  ;;  %p129_p0 = scmp.lt.u32.totalorder %s125_s4, %s197_s3 }
 0x160   :  { %p131_p1 = pnand %p129_p0, %p126_p13 }
 0x162   :  { %134 = shalt.err (!%p131_p1)
}
 0x163   :  { %77 = dma.vmem_to_hbm [thread:$0]  %s75_s28, 64, %s197_s3, [#allocation4]  }
 0x164   :  { %137 = dma.done.wait [#allocation4], 64  }
 0x165   :  { %138 = vsyncadd [#allocation4], 4294967232 }
 0x166   :  { %81 = vsyncpa [#allocation3], 1 }
 0x167   :  { %82 = vsyncpa [#allocation4], 1 }

</bundles_post_ra>
